<compile_context>
chip_gen: v7x
topology: tpu7x:2x2x1
jax: 0.10.0
libtpu: 0.0.40
codegen_flags: <defaults>
</compile_context>

<pallas_src>
import functools

import jax
import jax.numpy as jnp
from jax.experimental import pallas as pl
from jax.experimental.pallas import tpu as pltpu


def attention_kernel(x_ref, wq_ref, wk_ref, wv_ref, wp_ref, bp_ref, o_ref, *,
                     num_heads, scale):
    """One grid step = one batch element; heads are batched (no unrolled head loop)."""
    H = num_heads
    x = x_ref[0]                                    # (N, C) bf16
    N, C = x.shape

    # Head-batched view of x (single hoisted broadcast).  MXU flops are identical to
    # one (N,C)x(C,3C) matmul, but the result lands head-major with no in-kernel
    # reshape/transpose or lane-misaligned slicing.
    xh = jnp.broadcast_to(x, (H, N, C))

    # q/k/v projections: (H,N,C) @ (H,C,D) -> (H,N,D), bf16 in, f32 accumulate.
    q = jnp.einsum('hnc,hcd->hnd', xh, wq_ref[...], preferred_element_type=jnp.float32)
    k = jnp.einsum('hnc,hcd->hnd', xh, wk_ref[...], preferred_element_type=jnp.float32)
    v = jnp.einsum('hnc,hcd->hnd', xh, wv_ref[...], preferred_element_type=jnp.float32)

    # Module quirk #1: q is pre-scaled AND SDPA scales again -> logits get scale**2.
    logits = jnp.einsum('hnd,hmd->hnm',
                        q.astype(jnp.bfloat16), k.astype(jnp.bfloat16),
                        preferred_element_type=jnp.float32) * (scale * scale)

    # Softmax in f32; divide goes to the EUP via approx reciprocal (row-sum >= 1).
    logits = logits - jnp.max(logits, axis=-1, keepdims=True)
    p = jnp.exp(logits)
    attn = p * pl.reciprocal(jnp.sum(p, axis=-1, keepdims=True), approx=True)
    # attn_drop / proj_drop are 0.0 at eval -> identity.

    v_bf = v.astype(jnp.bfloat16)
    sdpa = jnp.einsum('hnm,hmd->hnd', attn.astype(jnp.bfloat16), v_bf,
                      preferred_element_type=jnp.float32)          # SDPA output (H,N,D)
    # Module quirk #2: the SDPA output is multiplied by v again (needs D == N).
    heads = jnp.einsum('hnk,hkd->hnd', sdpa.astype(jnp.bfloat16), v_bf,
                       preferred_element_type=jnp.float32)         # (H, N, D)

    # Output projection folded per head: out = sum_h heads_h @ Wp_h  (+ bias).
    # Replaces transpose(1,2).reshape + concatenate with a lane-aligned batched
    # matmul and a cheap major-axis reduction (no extra (N,C) VMEM round trip).
    partial = jnp.einsum('hnd,hdc->hnc', heads.astype(jnp.bfloat16), wp_ref[...],
                         preferred_element_type=jnp.float32)       # (H, N, C_pad)
    out = jnp.sum(partial, axis=0) + bp_ref[...]                   # (N, C_pad)
    o_ref[0] = out.astype(o_ref.dtype)


def attention_forward(x, wqkv, wproj, bproj, num_heads):
    B, N, C = x.shape
    H = num_heads
    D = C // H
    scale = float(D) ** -0.5
    C_pad = ((C + 127) // 128) * 128        # lane-dense output columns (unmasked vst)

    # nn.Linear stores (out_features, in_features); y = x @ W.T.
    w_t = wqkv.T                            # (C, 3C), columns = [q | k | v]
    wq = w_t[:, 0 * C:1 * C].reshape(C, H, D).transpose(1, 0, 2)   # (H, C, D)
    wk = w_t[:, 1 * C:2 * C].reshape(C, H, D).transpose(1, 0, 2)
    wv = w_t[:, 2 * C:3 * C].reshape(C, H, D).transpose(1, 0, 2)
    wp = wproj.T.reshape(H, D, C)                                  # (H, D, C)
    wp = jnp.pad(wp, ((0, 0), (0, 0), (0, C_pad - C)))             # pad to lane-dense
    bp = jnp.pad(bproj, (0, C_pad - C)).reshape(1, C_pad).astype(jnp.float32)

    # bf16 matmul operands: halves HBM->VMEM bytes and weight VMEM residency, puts
    # the MXU in native bf16 mode; f32 accumulation inside the kernel.
    x_bf = x.astype(jnp.bfloat16)
    wq = wq.astype(jnp.bfloat16)
    wk = wk.astype(jnp.bfloat16)
    wv = wv.astype(jnp.bfloat16)
    wp = wp.astype(jnp.bfloat16)

    kernel = functools.partial(attention_kernel, num_heads=H, scale=scale)
    out_padded = pl.pallas_call(
        kernel,
        out_shape=jax.ShapeDtypeStruct((B, N, C_pad), x.dtype),
        grid_spec=pltpu.PrefetchScalarGridSpec(
            num_scalar_prefetch=0,
            grid=(B,),
            in_specs=[
                pl.BlockSpec((1, N, C), lambda b: (b, 0, 0)),      # per-batch x tile
                # Weight blocks have constant index maps (resident across grid steps).
                # At production channel sizes, additionally single-buffer these
                # (pipeline_mode=pl.Buffered(1)) or tile the 3C axis; with bf16 and
                # the raised vmem limit below they fit comfortably on v5e/v6e/v7x.
                pl.BlockSpec((H, C, D), lambda b: (0, 0, 0)),
                pl.BlockSpec((H, C, D), lambda b: (0, 0, 0)),
                pl.BlockSpec((H, C, D), lambda b: (0, 0, 0)),
                pl.BlockSpec((H, D, C_pad), lambda b: (0, 0, 0)),
                pl.BlockSpec((1, C_pad), lambda b: (0, 0)),
            ],
            out_specs=pl.BlockSpec((1, N, C_pad), lambda b: (b, 0, 0)),
        ),
        compiler_params=pltpu.CompilerParams(
            dimension_semantics=("parallel",),     # batch axis sharded across TCs
            vmem_limit_bytes=48 * 1024 * 1024,     # above 16/32 MiB scoped defaults
        ),
    )(x_bf, wq, wk, wv, wp, bp)
    return out_padded[:, :, :C]


def attention_reference(x, wqkv, wproj, bproj, num_heads):
    """Pure-JAX f32 mirror of the PyTorch forward for validation."""
    B, N, C = x.shape
    D = C // num_heads
    scale = float(D) ** -0.5
    qkv = x @ wqkv.T                                            # (B, N, 3C)
    qkv = qkv.reshape(B, N, 3, num_heads, D).transpose(2, 0, 3, 1, 4)
    q, k, v = qkv[0] * scale, qkv[1], qkv[2]
    logits = jnp.einsum('bhnd,bhmd->bhnm', q, k) * scale
    attn = jax.nn.softmax(logits, axis=-1)
    sdpa = jnp.einsum('bhnm,bhmd->bhnd', attn, v)
    out = jnp.einsum('bhnk,bhkd->bhnd', sdpa, v)                # the extra `attn @ v`
    out = out.transpose(0, 2, 1, 3).reshape(B, N, C)
    return out @ wproj.T + bproj[None, None, :]


if __name__ == "__main__":
    B, N, num_heads, dim = 2, 8, 4, 32      # head_dim = 8 == N (required by `attn @ v`)
    key = jax.random.PRNGKey(0)
    kx, kqkv, kproj, kb = jax.random.split(key, 4)

    x = jax.random.normal(kx, (B, N, dim), dtype=jnp.float32)
    # nn.Linear weight shapes: qkv -> (3*dim, dim), proj -> (dim, dim), proj bias -> (dim,)
    wqkv = jax.random.normal(kqkv, (3 * dim, dim), dtype=jnp.float32) * 0.05
    wproj = jax.random.normal(kproj, (dim, dim), dtype=jnp.float32) * 0.05
    bproj = jax.random.normal(kb, (dim,), dtype=jnp.float32) * 0.05

    out = attention_forward(x, wqkv, wproj, bproj, num_heads)
    out = jax.block_until_ready(out)

    ref = attention_reference(x, wqkv, wproj, bproj, num_heads)
    assert out.shape == (B, N, dim)
    # bf16 matmul operands + approx reciprocal vs f32 reference -> loosened tolerance.
    assert jnp.allclose(out, ref, atol=2e-2, rtol=2e-2), "mismatch vs pure-JAX reference"

    print("KERNEL_OK")
</pallas_src>

<mosaic_0001>
module attributes {stable_mosaic.version = 11 : i64} {
  func.func @attention_kernel(%arg0: i32, %arg1: memref<1x8x32xbf16, #tpu.memory_space<vmem>>, %arg2: memref<4x32x8xbf16, #tpu.memory_space<vmem>>, %arg3: memref<4x32x8xbf16, #tpu.memory_space<vmem>>, %arg4: memref<4x32x8xbf16, #tpu.memory_space<vmem>>, %arg5: memref<4x8x128xbf16, #tpu.memory_space<vmem>>, %arg6: memref<1x128xf32, #tpu.memory_space<vmem>>, %arg7: memref<1x8x128xf32, #tpu.memory_space<vmem>>) attributes {dimension_semantics = [#tpu.dimension_semantics<parallel>], iteration_bounds = array<i64: 2>, scalar_prefetch = 0 : i64, scratch_operands = 0 : i64, tpu.core_type = #tpu.core_type<tc>, window_params = [{transform_indices = @transform_0, window_bounds = array<i64: 1, 8, 32>}, {pipeline_mode = #tpu.pipeline_mode<synchronous>, transform_indices = @transform_1, window_bounds = array<i64: 4, 32, 8>}, {pipeline_mode = #tpu.pipeline_mode<synchronous>, transform_indices = @transform_2, window_bounds = array<i64: 4, 32, 8>}, {pipeline_mode = #tpu.pipeline_mode<synchronous>, transform_indices = @transform_3, window_bounds = array<i64: 4, 32, 8>}, {pipeline_mode = #tpu.pipeline_mode<synchronous>, transform_indices = @transform_4, window_bounds = array<i64: 4, 8, 128>}, {pipeline_mode = #tpu.pipeline_mode<synchronous>, transform_indices = @transform_5, window_bounds = array<i64: 1, 128>}, {transform_indices = @transform_6, window_bounds = array<i64: 1, 8, 128>}]} {
    %c0 = arith.constant 0 : index
    %c0_0 = arith.constant 0 : index
    %c0_1 = arith.constant 0 : index
    %0 = vector.load %arg1[%c0, %c0_0, %c0_1] : memref<1x8x32xbf16, #tpu.memory_space<vmem>>, vector<1x8x32xbf16>
    %1 = vector.shape_cast %0 : vector<1x8x32xbf16> to vector<8x32xbf16>
    %2 = vector.shape_cast %1 : vector<8x32xbf16> to vector<1x8x32xbf16>
    %3 = vector.broadcast %2 : vector<1x8x32xbf16> to vector<4x8x32xbf16>
    %c0_2 = arith.constant 0 : index
    %c0_3 = arith.constant 0 : index
    %c0_4 = arith.constant 0 : index
    %4 = vector.load %arg2[%c0_2, %c0_3, %c0_4] : memref<4x32x8xbf16, #tpu.memory_space<vmem>>, vector<4x32x8xbf16>
    "tpu.trace_start"() <{level = 10 : i32, message = "hnc,hcd->hnd"}> : () -> ()
    %cst = arith.constant dense<0.000000e+00> : vector<4x8x8xf32>
    %5 = tpu.matmul %3, %4, %cst {dimension_numbers = #tpu.dot_dimension_numbers<[2], [1], [1], [2], [0, 0, 0, 1, 1, 2], [0], [0]>} : vector<4x8x32xbf16>, vector<4x32x8xbf16>, vector<4x8x8xf32> -> vector<4x8x8xf32>
    "tpu.trace_stop"() : () -> ()
    %c0_5 = arith.constant 0 : index
    %c0_6 = arith.constant 0 : index
    %c0_7 = arith.constant 0 : index
    %6 = vector.load %arg3[%c0_5, %c0_6, %c0_7] : memref<4x32x8xbf16, #tpu.memory_space<vmem>>, vector<4x32x8xbf16>
    "tpu.trace_start"() <{level = 10 : i32, message = "hnc,hcd->hnd"}> : () -> ()
    %cst_8 = arith.constant dense<0.000000e+00> : vector<4x8x8xf32>
    %7 = tpu.matmul %3, %6, %cst_8 {dimension_numbers = #tpu.dot_dimension_numbers<[2], [1], [1], [2], [0, 0, 0, 1, 1, 2], [0], [0]>} : vector<4x8x32xbf16>, vector<4x32x8xbf16>, vector<4x8x8xf32> -> vector<4x8x8xf32>
    "tpu.trace_stop"() : () -> ()
    %c0_9 = arith.constant 0 : index
    %c0_10 = arith.constant 0 : index
    %c0_11 = arith.constant 0 : index
    %8 = vector.load %arg4[%c0_9, %c0_10, %c0_11] : memref<4x32x8xbf16, #tpu.memory_space<vmem>>, vector<4x32x8xbf16>
    "tpu.trace_start"() <{level = 10 : i32, message = "hnc,hcd->hnd"}> : () -> ()
    %cst_12 = arith.constant dense<0.000000e+00> : vector<4x8x8xf32>
    %9 = tpu.matmul %3, %8, %cst_12 {dimension_numbers = #tpu.dot_dimension_numbers<[2], [1], [1], [2], [0, 0, 0, 1, 1, 2], [0], [0]>} : vector<4x8x32xbf16>, vector<4x32x8xbf16>, vector<4x8x8xf32> -> vector<4x8x8xf32>
    "tpu.trace_stop"() : () -> ()
    %10 = arith.truncf %5 : vector<4x8x8xf32> to vector<4x8x8xbf16>
    %11 = arith.truncf %7 : vector<4x8x8xf32> to vector<4x8x8xbf16>
    "tpu.trace_start"() <{level = 10 : i32, message = "hnd,hmd->hnm"}> : () -> ()
    %cst_13 = arith.constant dense<0.000000e+00> : vector<4x8x8xf32>
    %12 = tpu.matmul %10, %11, %cst_13 {dimension_numbers = #tpu.dot_dimension_numbers<[2], [2], [1], [1], [0, 0, 0, 1, 1, 1], [0], [0]>} : vector<4x8x8xbf16>, vector<4x8x8xbf16>, vector<4x8x8xf32> -> vector<4x8x8xf32>
    "tpu.trace_stop"() : () -> ()
    %cst_14 = arith.constant 1.250000e-01 : f32
    %13 = vector.broadcast %cst_14 : f32 to vector<4x8x8xf32>
    %14 = arith.mulf %12, %13 : vector<4x8x8xf32>
    %cst_15 = arith.constant dense<0xFF800000> : vector<4x8xf32>
    %15 = vector.multi_reduction <maximumf>, %14, %cst_15 [2] : vector<4x8x8xf32> to vector<4x8xf32>
    %16 = vector.shape_cast %15 : vector<4x8xf32> to vector<4x8x1xf32>
    %17 = vector.broadcast %16 : vector<4x8x1xf32> to vector<4x8x8xf32>
    %18 = arith.subf %14, %17 : vector<4x8x8xf32>
    %19 = math.exp %18 : vector<4x8x8xf32>
    %cst_16 = arith.constant dense<0.000000e+00> : vector<4x8xf32>
    %20 = vector.multi_reduction <add>, %19, %cst_16 [2] : vector<4x8x8xf32> to vector<4x8xf32>
    %21 = vector.shape_cast %20 : vector<4x8xf32> to vector<4x8x1xf32>
    %22 = tpu.reciprocal %21 {approx = true} : vector<4x8x1xf32> -> vector<4x8x1xf32>
    %23 = vector.broadcast %22 : vector<4x8x1xf32> to vector<4x8x8xf32>
    %24 = arith.mulf %19, %23 : vector<4x8x8xf32>
    %25 = arith.truncf %9 : vector<4x8x8xf32> to vector<4x8x8xbf16>
    %26 = arith.truncf %24 : vector<4x8x8xf32> to vector<4x8x8xbf16>
    "tpu.trace_start"() <{level = 10 : i32, message = "hnm,hmd->hnd"}> : () -> ()
    %cst_17 = arith.constant dense<0.000000e+00> : vector<4x8x8xf32>
    %27 = tpu.matmul %26, %25, %cst_17 {dimension_numbers = #tpu.dot_dimension_numbers<[2], [1], [1], [2], [0, 0, 0, 1, 1, 2], [0], [0]>} : vector<4x8x8xbf16>, vector<4x8x8xbf16>, vector<4x8x8xf32> -> vector<4x8x8xf32>
    "tpu.trace_stop"() : () -> ()
    %28 = arith.truncf %27 : vector<4x8x8xf32> to vector<4x8x8xbf16>
    "tpu.trace_start"() <{level = 10 : i32, message = "hnk,hkd->hnd"}> : () -> ()
    %cst_18 = arith.constant dense<0.000000e+00> : vector<4x8x8xf32>
    %29 = tpu.matmul %28, %25, %cst_18 {dimension_numbers = #tpu.dot_dimension_numbers<[2], [1], [1], [2], [0, 0, 0, 1, 1, 2], [0], [0]>} : vector<4x8x8xbf16>, vector<4x8x8xbf16>, vector<4x8x8xf32> -> vector<4x8x8xf32>
    "tpu.trace_stop"() : () -> ()
    %30 = arith.truncf %29 : vector<4x8x8xf32> to vector<4x8x8xbf16>
    %c0_19 = arith.constant 0 : index
    %c0_20 = arith.constant 0 : index
    %c0_21 = arith.constant 0 : index
    %31 = vector.load %arg5[%c0_19, %c0_20, %c0_21] : memref<4x8x128xbf16, #tpu.memory_space<vmem>>, vector<4x8x128xbf16>
    "tpu.trace_start"() <{level = 10 : i32, message = "hnd,hdc->hnc"}> : () -> ()
    %cst_22 = arith.constant dense<0.000000e+00> : vector<4x8x128xf32>
    %32 = tpu.matmul %30, %31, %cst_22 {dimension_numbers = #tpu.dot_dimension_numbers<[2], [1], [1], [2], [0, 0, 0, 1, 1, 2], [0], [0]>} : vector<4x8x8xbf16>, vector<4x8x128xbf16>, vector<4x8x128xf32> -> vector<4x8x128xf32>
    "tpu.trace_stop"() : () -> ()
    %cst_23 = arith.constant dense<0.000000e+00> : vector<8x128xf32>
    %33 = vector.multi_reduction <add>, %32, %cst_23 [0] : vector<4x8x128xf32> to vector<8x128xf32>
    %c0_24 = arith.constant 0 : index
    %c0_25 = arith.constant 0 : index
    %34 = vector.load %arg6[%c0_24, %c0_25] : memref<1x128xf32, #tpu.memory_space<vmem>>, vector<1x128xf32>
    %35 = vector.broadcast %34 : vector<1x128xf32> to vector<8x128xf32>
    %36 = arith.addf %33, %35 : vector<8x128xf32>
    %c0_26 = arith.constant 0 : index
    %c0_27 = arith.constant 0 : index
    %c0_28 = arith.constant 0 : index
    %37 = vector.load %arg7[%c0_26, %c0_27, %c0_28] : memref<1x8x128xf32, #tpu.memory_space<vmem>>, vector<1x8x128xf32>
    %38 = vector.shape_cast %37 : vector<1x8x128xf32> to vector<8x128xf32>
    %39 = vector.shape_cast %36 : vector<8x128xf32> to vector<1x8x128xf32>
    tpu.vector_store %arg7[%c0_26, %c0_27, %c0_28], %39 {strides = array<i32>} : memref<1x8x128xf32, #tpu.memory_space<vmem>>, vector<1x8x128xf32>,
    return
  }
  func.func @transform_0(%arg0: i32) -> (i32, i32, i32) {
    %c0_i32 = arith.constant 0 : i32
    %c0_i32_0 = arith.constant 0 : i32
    %c0_i32_1 = arith.constant 0 : i32
    return %arg0, %c0_i32, %c0_i32_0 : i32, i32, i32
  }
  func.func @transform_1(%arg0: i32) -> (i32, i32, i32) {
    %c0_i32 = arith.constant 0 : i32
    %c0_i32_0 = arith.constant 0 : i32
    %c0_i32_1 = arith.constant 0 : i32
    %c0_i32_2 = arith.constant 0 : i32
    return %c0_i32, %c0_i32_0, %c0_i32_1 : i32, i32, i32
  }
  func.func @transform_2(%arg0: i32) -> (i32, i32, i32) {
    %c0_i32 = arith.constant 0 : i32
    %c0_i32_0 = arith.constant 0 : i32
    %c0_i32_1 = arith.constant 0 : i32
    %c0_i32_2 = arith.constant 0 : i32
    return %c0_i32, %c0_i32_0, %c0_i32_1 : i32, i32, i32
  }
  func.func @transform_3(%arg0: i32) -> (i32, i32, i32) {
    %c0_i32 = arith.constant 0 : i32
    %c0_i32_0 = arith.constant 0 : i32
    %c0_i32_1 = arith.constant 0 : i32
    %c0_i32_2 = arith.constant 0 : i32
    return %c0_i32, %c0_i32_0, %c0_i32_1 : i32, i32, i32
  }
  func.func @transform_4(%arg0: i32) -> (i32, i32, i32) {
    %c0_i32 = arith.constant 0 : i32
    %c0_i32_0 = arith.constant 0 : i32
    %c0_i32_1 = arith.constant 0 : i32
    %c0_i32_2 = arith.constant 0 : i32
    return %c0_i32, %c0_i32_0, %c0_i32_1 : i32, i32, i32
  }
  func.func @transform_5(%arg0: i32) -> (i32, i32) {
    %c0_i32 = arith.constant 0 : i32
    %c0_i32_0 = arith.constant 0 : i32
    %c0_i32_1 = arith.constant 0 : i32
    return %c0_i32, %c0_i32_0 : i32, i32
  }
  func.func @transform_6(%arg0: i32) -> (i32, i32, i32) {
    %c0_i32 = arith.constant 0 : i32
    %c0_i32_0 = arith.constant 0 : i32
    %c0_i32_1 = arith.constant 0 : i32
    return %arg0, %c0_i32, %c0_i32_0 : i32, i32, i32
  }
}

</mosaic_0001>

<bundles_post_ra>
// kernel: tpu_custom_call.1
= control target key start
LH: loop header
LB: loop body
LE: loop exit
PB: predicated region body
PF: predicated region fallthrough
CT: control target
= control target key end

     0   :  { %11 = vsyncpa [#allocation3], 0  ;;  %s2679_s0 = inlined_call_operand.vmem [shape: bf16[2,8,32], index: 0, kind: input, shape index: {}]   ;;  %s2680_s1 = inlined_call_operand.vmem [shape: bf16[4,32,8], index: 1, kind: input, shape index: {}]   ;;  %s2681_s2 = inlined_call_operand.vmem [shape: bf16[4,32,8], index: 2, kind: input, shape index: {}]   ;;  %s2682_s3 = inlined_call_operand.vmem [shape: bf16[4,32,8], index: 3, kind: input, shape index: {}]   ;;  %s2683_s4 = inlined_call_operand.vmem [shape: bf16[4,8,128], index: 4, kind: input, shape index: {}]   ;;  %s2684_s5 = inlined_call_operand.vmem [shape: f32[1,128], index: 5, kind: input, shape index: {}]   ;;  %s2685_s6 = inlined_call_operand.hbm [shape: f32[2,8,128], index: 6, kind: output, shape index: {}]  }
   0x1   :  { %13 = vsyncpa [#allocation3 + $0x1], 0  ;;  %s2318_s21 = smov 0   ;;  %s2320_s22 = smov 0  }
   0x2   :  { %s2322_s23 = smov 0   ;;  %s2324_s24 = smov 0  }
   0x3 LB: > { %s2339_s25 = sadd.s32 4294967295, %s2278_s24   ;;  %s1812_s26 = sadd.s32 4294967294, %s2278_s24   ;;  %s2278_s24 = sphi %s2324_s24, %s2691_s24   ;;  %s2274_s23 = sphi %s2322_s23, %s2690_s23   ;;  %s2270_s22 = sphi %s2320_s22, %s2689_s22   ;;  %s2266_s21 = sphi %s2318_s21, %s2688_s21  }
   0x4   : > { %s2343_s27 = sadd.s32 1, %s2278_s24   ;;  %s157_s28 = sadd.s32 1, %s2274_s23 }
   0x5   : > { %s154_s29 = ssub.s32 %s2278_s24, %s2343_s27  ;;  %p167_p0 = scmp.ne.s32.totalorder %s2274_s23, %s2270_s22 }
   0x6   : > { %p155_p1 = scmp.eq.s32.totalorder %s154_s29, 0  ;;  %p168_p2 = scmp.eq.s32.totalorder %s2339_s25, 1 }
   0x7   : > { %p173_p3 = scmp.ne.s32.totalorder %s2270_s22, %s2266_s21  ;;  %p174_p4 = scmp.eq.s32.totalorder %s1812_s26, 1 }
   0x8   : > { %s2354_s30 = scalar_select %p155_p1, %s2274_s23, %s157_s28  }
   0x9   : > { %p2356_p5 = por %p168_p2, %p167_p0  ;;  %p2360_p6 = por %p174_p4, %p173_p3 }
   0xa   : > { %p1815_p7 = scmp.ge.s32.totalorder %s2278_s24, 1  ;;  %p214_p8 = scmp.lt.s32.totalorder %s2278_s24, 3 }
   0xc   : > { %p215_p9 = pnand %p1815_p7, %p214_p8 }
   0xd   : > { %v2176_v0 = vld [vmem:[%s2680_s1] sm:$0xff] (!%p215_p9)   ;;  %v2280_v1 = vmov (!%p215_p9), 0.0   ;;  %v2177_v2 = vld [vmem:[%s2680_s1 + $0x10] sm:$0xff] (!%p215_p9)   ;;  %v2178_v3 = vld [vmem:[%s2680_s1 + $0x8] sm:$0xff] (!%p215_p9)   ;;  %vm2281_vm0 = vmmov (!%p215_p9), 0   ;;  %p243_p10 = scmp.lt.s32.totalorder (!%p215_p9), %s2339_s25, 1 }
   0xe   : > { %218 = sbr.rel (%p215_p9) target bundleno = 1464 (0x5b8), region = 44  ;;  %1943 = vmatprep.subr.bf16.mxu0 (!%p215_p9), %v2280_v1  ;;  %1951 = vmatprep.subr.bf16.mxu1 (!%p215_p9), %v2280_v1  ;;  %v2179_v4 = vld [vmem:[%s2680_s1 + $0x18] sm:$0xff] (!%p215_p9)   ;;  %vm277_vm1 = vcmask (!%p215_p9), 261120   ;;  %v2180_v5 = vld [vmem:[%s2680_s1 + $0x20] sm:$0xff] (!%p215_p9)   ;;  %v2181_v6 = vld [vmem:[%s2680_s1 + $0x30] sm:$0xff] (!%p215_p9)   ;;  %vm933_vm2 = vcmask (!%p215_p9), 64512  }
   0xf   : > { %1944 = vmatpush3.bf16.msra.mxu0 (!%p215_p9), %v2176_v0  ;;  %1947 = vmatprep.mubr.msk.bf16.mxu0 (!%p215_p9), %vm2281_vm0, %v2280_v1  ;;  %v2182_v8 = vld [vmem:[%s2680_s1 + $0x28] sm:$0xff] (!%p215_p9)   ;;  %v2183_v9 = vld [vmem:[%s2680_s1 + $0x38] sm:$0xff] (!%p215_p9)   ;;  %v2184_v10 = vld [vmem:[%s2681_s2] sm:$0xff] (!%p215_p9)   ;;  %vm1177_vm3 = vcmask (!%p215_p9), 1043456   ;;  %s240_s10 = sand.u32 (!%p215_p9), 1, %s2270_s22   ;;  %s1872_s14 = sshll.u32 (!%p215_p9), %s2339_s25, 7 }
  0x10   : > { %1952 = vmatpush3.bf16.msra.mxu1 (!%p215_p9), %v2177_v2  ;;  %1945 = vmatprep.subr.bf16.mxu0 (!%p215_p9), %v2280_v1  ;;  %v2185_v11 = vld [vmem:[%s2681_s2 + $0x10] sm:$0xff] (!%p215_p9)   ;;  %v2186_v12 = vld [vmem:[%s2681_s2 + $0x8] sm:$0xff] (!%p215_p9)   ;;  %v2187_v13 = vld [vmem:[%s2681_s2 + $0x18] sm:$0xff] (!%p215_p9)   ;;  %s1816_s11 = sshll.u32 (!%p215_p9), %s240_s10, 3  ;;  %s2637_s19 = scalar_lea.hbm (!%p215_p9), %s2685_s6, %s1872_s14 }
  0x11   : > { %1953 = vmatprep.subr.bf16.mxu1 (!%p215_p9), %v2280_v1  ;;  %1955 = vmatprep.mubr.msk.bf16.mxu1 (!%p215_p9), %vm2281_vm0, %v2280_v1  ;;  %v2188_v14 = vld [vmem:[%s2681_s2 + $0x20] sm:$0xff] (!%p215_p9)   ;;  %v2189_v15 = vld [vmem:[%s2681_s2 + $0x30] sm:$0xff] (!%p215_p9)   ;;  %v2190_v16 = vld [vmem:[%s2681_s2 + $0x28] sm:$0xff] (!%p215_p9)   ;;  %s242_s15 = scalar_lea.vmem (!%p215_p9), [#allocation2], %s1816_s11  ;;  %s1740_s20 = scalar_lea.sflag (!%p215_p9), [#allocation3], %s240_s10 }
  0x12   : > { %v2191_v17 = vld [vmem:[%s2681_s2 + $0x38] sm:$0xff] (!%p215_p9)   ;;  %v2192_v18 = vld [vmem:[%s2682_s3] sm:$0xff] (!%p215_p9)   ;;  %v2193_v19 = vld [vmem:[%s2682_s3 + $0x10] sm:$0xff] (!%p215_p9)   ;;  %s1753_s16 = sshll.u32 (!%p215_p9), %s242_s15, 4  ;;  %s2282_s26 = smov (!%p215_p9), [#allocation2]   ;;  %s2639_s16 = int_to_ptr.vmem [resolvable:$true] %s1753_s16 }
  0x13   : > { %1946 = vmatpush3.bf16.msra.mxu0 (!%p215_p9), %v2178_v3  ;;  %v2194_v20 = vld [vmem:[%s2682_s3 + $0x8] sm:$0xff] (!%p215_p9)   ;;  %v2195_v21 = vld [vmem:[%s2682_s3 + $0x18] sm:$0xff] (!%p215_p9)   ;;  %v2196_v22 = vld [vmem:[%s2682_s3 + $0x20] sm:$0xff] (!%p215_p9)   ;;  %s2220_s28 = sshll.u32 (!%p215_p9), %s2282_s26, 4  ;;  %s2221_s28 = int_to_ptr.vmem [resolvable:$false] %s2220_s28 }
  0x14   : > { %1954 = vmatpush3.bf16.msra.mxu1 (!%p215_p9), %v2179_v4  ;;  %1959 = vmatprep.subr.bf16.mxu0 (!%p215_p9), %v2280_v1  ;;  %v2197_v23 = vld [vmem:[%s2682_s3 + $0x30] sm:$0xff] (!%p215_p9)   ;;  %v2198_v24 = vld [vmem:[%s2682_s3 + $0x28] sm:$0xff] (!%p215_p9)   ;;  %v2199_v25 = vld [vmem:[%s2682_s3 + $0x38] sm:$0xff] (!%p215_p9)   ;;  %p2223_p0 = scmp.lt.s32.totalorder (!%p215_p9), %s2639_s16, %s2221_s28 }
  0x15   : > { %s244_s17 = scalar_select %p243_p10, %s2339_s25, 1  ;;  %1967 = vmatprep.subr.bf16.mxu1 %v2280_v1 }
  0x16   : > { %s2216_s25 = scalar_lea.vmem %s2639_s16, 128 }
  0x17   : > { %s1817_s18 = sshll.u32 %s244_s17, 2  ;;  %p2217_p11 = scmp.ne.s32.totalorder %s2639_s16, %s2216_s25 }
  0x18   : > { %s246_s29 = scalar_lea.vmem %s2679_s0, %s1817_s18 }
  0x19   : > { %v2398_v7 = vld [vmem:[%s246_s29] sm:$0xf]  ;;  %p2218_p12 = pnand %p2217_p11, %p2356_p5  ;;  %s2222_s29 = scalar_lea.vmem %s2221_s28, 256 }
  0x1a   : > { %1948 = vmatmul.mubr.msk.bf16.vlgmr.msra.gmra.mrb[0].mxu0 %vm277_vm1, %v2398_v7  ;;  %1956 = vmatmul.mubr.msk.bf16.vlgmr.msra.gmra.mrb[0].mxu1 %vm277_vm1, %v2398_v7  ;;  %p2224_p1 = scmp.lt.s32.totalorder %s2222_s29, %s2216_s25 }
  0x1b   : > { %1960 = vmatpush3.bf16.msra.mxu0 %v2180_v5  ;;  %1968 = vmatpush3.bf16.msra.mxu1 %v2181_v6  ;;  %p2219_p13 = pneg %p2218_p12 }
  0x1c   : > { %1961 = vmatprep.subr.bf16.mxu0 %v2280_v1  ;;  %1969 = vmatprep.subr.bf16.mxu1 %v2280_v1  ;;  %p2225_p2 = por %p2224_p1, %p2223_p0 }
  0x1d   : > { %1963 = vmatprep.mubr.msk.bf16.mxu0 %vm2281_vm0, %v2280_v1  ;;  %1971 = vmatprep.mubr.msk.bf16.mxu1 %vm2281_vm0, %v2280_v1 }
  0x1e   : > { %p2226_p3 = pnand %p2225_p2, %p2219_p13 }
  0x1f   : > { %1962 = vmatpush3.bf16.msra.mxu0 %v2182_v8  ;;  %1970 = vmatpush3.bf16.msra.mxu1 %v2183_v9 }
  0x20   : > { %1975 = vmatprep.subr.bf16.mxu0 %v2280_v1  ;;  %1983 = vmatprep.subr.bf16.mxu1 %v2280_v1 }
  0x22   : > { %1964 = vmatmul.mubr.msk.bf16.vlgmr.msra.gmra.mrb[4].mxu0 %vm277_vm1, %v2398_v7  ;;  %1972 = vmatmul.mubr.msk.bf16.vlgmr.msra.gmra.mrb[4].mxu1 %vm277_vm1, %v2398_v7 }
  0x23   : > { %1976 = vmatpush3.bf16.msra.mxu0 %v2184_v10  ;;  %1984 = vmatpush3.bf16.msra.mxu1 %v2185_v11 }
  0x24   : > { %1977 = vmatprep.subr.bf16.mxu0 %v2280_v1  ;;  %1985 = vmatprep.subr.bf16.mxu1 %v2280_v1 }
  0x25   : > { %1979 = vmatprep.mubr.msk.bf16.mxu0 %vm2281_vm0, %v2280_v1  ;;  %1987 = vmatprep.mubr.msk.bf16.mxu1 %vm2281_vm0, %v2280_v1 }
  0x27   : > { %1978 = vmatpush3.bf16.msra.mxu0 %v2186_v12  ;;  %1986 = vmatpush3.bf16.msra.mxu1 %v2187_v13 }
  0x28   : > { %1991 = vmatprep.subr.bf16.mxu0 %v2280_v1  ;;  %1999 = vmatprep.subr.bf16.mxu1 %v2280_v1 }
  0x2a   : > { %1980 = vmatmul.mubr.msk.bf16.vlgmr.msra.gmra.mrb[8].mxu0 %vm277_vm1, %v2398_v7  ;;  %1988 = vmatmul.mubr.msk.bf16.vlgmr.msra.gmra.mrb[8].mxu1 %vm277_vm1, %v2398_v7 }
  0x2b   : > { %1992 = vmatpush3.bf16.msra.mxu0 %v2188_v14  ;;  %2000 = vmatpush3.bf16.msra.mxu1 %v2189_v15 }
  0x2c   : > { %1993 = vmatprep.subr.bf16.mxu0 %v2280_v1  ;;  %2001 = vmatprep.subr.bf16.mxu1 %v2280_v1 }
  0x2d   : > { %1995 = vmatprep.mubr.msk.bf16.mxu0 %vm2281_vm0, %v2280_v1  ;;  %2003 = vmatprep.mubr.msk.bf16.mxu1 %vm2281_vm0, %v2280_v1 }
  0x2f   : > { %1994 = vmatpush3.bf16.msra.mxu0 %v2190_v16  ;;  %2002 = vmatpush3.bf16.msra.mxu1 %v2191_v17 }
  0x30   : > { %2007 = vmatprep.subr.bf16.mxu0 %v2280_v1  ;;  %2015 = vmatprep.subr.bf16.mxu1 %v2280_v1 }
  0x32   : > { %1996 = vmatmul.mubr.msk.bf16.vlgmr.msra.gmra.mrb[12].mxu0 %vm277_vm1, %v2398_v7  ;;  %2004 = vmatmul.mubr.msk.bf16.vlgmr.msra.gmra.mrb[12].mxu1 %vm277_vm1, %v2398_v7 }
  0x33   : > { %2008 = vmatpush3.bf16.msra.mxu0 %v2192_v18  ;;  %2016 = vmatpush3.bf16.msra.mxu1 %v2193_v19 }
  0x34   : > { %2009 = vmatprep.subr.bf16.mxu0 %v2280_v1  ;;  %2017 = vmatprep.subr.bf16.mxu1 %v2280_v1 }
  0x35   : > { %2011 = vmatprep.mubr.msk.bf16.mxu0 %vm2281_vm0, %v2280_v1  ;;  %2019 = vmatprep.mubr.msk.bf16.mxu1 %vm2281_vm0, %v2280_v1 }
  0x37   : > { %2010 = vmatpush3.bf16.msra.mxu0 %v2194_v20  ;;  %2018 = vmatpush3.bf16.msra.mxu1 %v2195_v21 }
  0x38   : > { %2023 = vmatprep.subr.bf16.mxu0 %v2280_v1  ;;  %2031 = vmatprep.subr.bf16.mxu1 %v2280_v1 }
  0x3a   : > { %2012 = vmatmul.mubr.msk.bf16.vlgmr.msra.gmra.mrb[16].mxu0 %vm277_vm1, %v2398_v7  ;;  %2020 = vmatmul.mubr.msk.bf16.vlgmr.msra.gmra.mrb[16].mxu1 %vm277_vm1, %v2398_v7 }
  0x3b   : > { %2024 = vmatpush3.bf16.msra.mxu0 %v2196_v22  ;;  %2027 = vmatprep.mubr.msk.bf16.mxu0 %vm2281_vm0, %v2280_v1 }
  0x3c   : > { %2025 = vmatprep.subr.bf16.mxu0 %v2280_v1  ;;  %2032 = vmatpush3.bf16.msra.mxu1 %v2197_v23 }
  0x3d   : > { %2035 = vmatprep.mubr.msk.bf16.mxu1 %vm2281_vm0, %v2280_v1  ;;  %2033 = vmatprep.subr.bf16.mxu1 %v2280_v1 }
  0x3f   : > { %2026 = vmatpush3.bf16.msra.mxu0 %v2198_v24 }
  0x40   : > { %2034 = vmatpush3.bf16.msra.mxu1 %v2199_v25  ;;  %2039 = vmatprep.subr.bf16.mxu0 %v2280_v1 }
  0x41   : > { %2045 = vmatprep.subr.bf16.mxu1 %v2280_v1 }
  0x42   : > { %2028 = vmatmul.mubr.msk.bf16.vlgmr.msra.gmra.mrb[20].mxu0 %vm277_vm1, %v2398_v7 }
  0x43   : > { %2036 = vmatmul.mubr.msk.bf16.vlgmr.msra.gmra.mrb[20].mxu1 %vm277_vm1, %v2398_v7  ;;  %2041 = vmatprep.mubr.msk.bf16.mxu0 %vm2281_vm0, %v2280_v1 }
  0x44   : > { %2047 = vmatprep.mubr.msk.bf16.mxu1 %vm2281_vm0, %v2280_v1 }
  0xed   : > { %v315_v26 = vpop.f32.mrb[0].mxu0  ;;  %v367_v28 = vpop.f32.mrb[0].mxu1 }
  0xee   : > { %v1949_v27 = vpop.f32.mrb[1].mxu0  ;;  %v1957_v30 = vpop.f32.mrb[1].mxu1  ;;  %v925_v55 = vpack.c.bf16 %v315_v26, %v315_v26  ;;  %v926_v59 = vpack.c.bf16 %v367_v28, %v367_v28 }
  0xef   : > { %v318_v29 = vpop.f32.mrb[2].mxu0  ;;  %v370_v32 = vpop.f32.mrb[2].mxu1 }
  0xf0   : > { %v1950_v31 = vpop.f32.mrb[3].mxu0  ;;  %v1958_v33 = vpop.f32.mrb[3].mxu1 }
  0xf5   : > { %v419_v34 = vpop.f32.mrb[4].mxu0  ;;  %v471_v36 = vpop.f32.mrb[4].mxu1 }
  0xf6   : > { %v1965_v35 = vpop.f32.mrb[5].mxu0  ;;  %v1973_v38 = vpop.f32.mrb[5].mxu1  ;;  %v927_v5 = vpack.c.bf16 %v419_v34, %v419_v34  ;;  %v928_v6 = vpack.c.bf16 %v471_v36, %v471_v36 }
  0xf7   : > { %v422_v37 = vpop.f32.mrb[6].mxu0  ;;  %v474_v40 = vpop.f32.mrb[6].mxu1 }
  0xf8   : > { %v1966_v39 = vpop.f32.mrb[7].mxu0  ;;  %v1974_v41 = vpop.f32.mrb[7].mxu1 }
  0xfd   : > { %v539_v42 = vpop.f32.mrb[8].mxu0  ;;  %v591_v44 = vpop.f32.mrb[8].mxu1 }
  0xfe   : > { %v929_v43 = vpack.c.bf16 %v539_v42, %v539_v42  ;;  %v1981_v45 = vpop.f32.mrb[9].mxu0  ;;  %v930_v46 = vpack.c.bf16 %v591_v44, %v591_v44  ;;  %v1989_v48 = vpop.f32.mrb[9].mxu1 }
  0xff   : > { %v542_v47 = vpop.f32.mrb[10].mxu0  ;;  %v594_v51 = vpop.f32.mrb[10].mxu1 }
 0x100   : > { %v938_v49 = vsel %vm933_vm2, %v929_v43, 0  ;;  %v1982_v50 = vpop.f32.mrb[11].mxu0  ;;  %v984_v52 = vsel %vm933_vm2, %v930_v46, 0  ;;  %v1990_v53 = vpop.f32.mrb[11].mxu1 }
 0x101   : > { %2040 = vmatpush3.bf16.xpose.msra.mxu0 %v938_v49  ;;  %2046 = vmatpush3.bf16.xpose.msra.mxu1 %v984_v52 }
 0x102   : > { %2051 = vmatprep.subr.bf16.mxu0 %v2280_v1  ;;  %2057 = vmatprep.subr.bf16.mxu1 %v2280_v1 }
 0x105   : > { %v643_v54 = vpop.f32.mrb[12].mxu0  ;;  %v695_v57 = vpop.f32.mrb[12].mxu1 }
 0x106   : > { %v931_v56 = vpack.c.bf16 %v643_v54, %v643_v54  ;;  %v1997_v58 = vpop.f32.mrb[13].mxu0  ;;  %v932_v60 = vpack.c.bf16 %v695_v57, %v695_v57  ;;  %v2005_v62 = vpop.f32.mrb[13].mxu1 }
 0x107   : > { %v646_v61 = vpop.f32.mrb[14].mxu0  ;;  %v698_v2 = vpop.f32.mrb[14].mxu1 }
 0x108   : > { %v1030_v63 = vsel %vm933_vm2, %v931_v56, 0  ;;  %v1998_v0 = vpop.f32.mrb[15].mxu0  ;;  %2042 = vmatmul.mubr.msk.bf16.vlgmr.msra.gmra.mrb[24].mxu0 %vm933_vm2, %v925_v55  ;;  %v1076_v3 = vsel %vm933_vm2, %v932_v60, 0  ;;  %2048 = vmatmul.mubr.msk.bf16.vlgmr.msra.gmra.mrb[24].mxu1 %vm933_vm2, %v926_v59  ;;  %v2006_v4 = vpop.f32.mrb[15].mxu1 }
 0x109   : > { %2052 = vmatpush3.bf16.xpose.msra.mxu0 %v1030_v63  ;;  %2058 = vmatpush3.bf16.xpose.msra.mxu1 %v1076_v3 }
 0x10a   : > { %2053 = vmatprep.mubr.msk.bf16.mxu0 %vm2281_vm0, %v2280_v1  ;;  %2059 = vmatprep.mubr.msk.bf16.mxu1 %vm2281_vm0, %v2280_v1 }
 0x10b   : > { %2063 = vmatprep.subr.bf16.mxu0 %v2280_v1  ;;  %2069 = vmatprep.subr.bf16.mxu1 %v2280_v1 }
 0x10d   : > { %v763_v7 = vpop.f32.mrb[16].mxu0  ;;  %v815_v11 = vpop.f32.mrb[16].mxu1 }
 0x10e   : > { %v1166_v8 = vpack.c.bf16 %v763_v7, %v763_v7  ;;  %v2013_v9 = vpop.f32.mrb[17].mxu0  ;;  %v1167_v14 = vpack.c.bf16 %v815_v11, %v815_v11  ;;  %v2021_v15 = vpop.f32.mrb[17].mxu1 }
 0x10f   : > { %v766_v10 = vpop.f32.mrb[18].mxu0  ;;  %v818_v16 = vpop.f32.mrb[18].mxu1 }
 0x110   : > { %2054 = vmatmul.mubr.msk.bf16.vlgmr.msra.gmra.mrb[28].mxu0 %vm933_vm2, %v927_v5  ;;  %2060 = vmatmul.mubr.msk.bf16.vlgmr.msra.gmra.mrb[28].mxu1 %vm933_vm2, %v928_v6  ;;  %v2544_v12 = vsel %vm1177_vm3, %v1166_v8, 0  ;;  %v2014_v13 = vpop.f32.mrb[19].mxu0  ;;  %v2548_v17 = vsel %vm1177_vm3, %v1167_v14, 0  ;;  %v2022_v18 = vpop.f32.mrb[19].mxu1 }
 0x111   : > { %2065 = vmatprep.mubr.msk.bf16.mxu0 %vm2281_vm0, %v2280_v1  ;;  %2071 = vmatprep.mubr.msk.bf16.mxu1 %vm2281_vm0, %v2280_v1 }
 0x112   : > { %2064 = vmatpush3.bf16.msra.mxu0 %v2544_v12  ;;  %2070 = vmatpush3.bf16.msra.mxu1 %v2548_v17 }
 0x113   : > { %2075 = vmatprep.subr.bf16.mxu0 %v2280_v1  ;;  %2081 = vmatprep.subr.bf16.mxu1 %v2280_v1 }
 0x115   : > { %v2553_v19 = vpop.f32.mrb[20].mxu0 }
 0x116   : > { %v2555_v20 = vpop.f32.mrb[20].mxu1  ;;  %v2029_v21 = vpop.f32.mrb[21].mxu0  ;;  %v1168_v13 = vpack.c.bf16 %v2553_v19, %v2553_v19 }
 0x117   : > { %v2037_v22 = vpop.f32.mrb[21].mxu1  ;;  %v870_v23 = vpop.f32.mrb[22].mxu0 }
 0x118   : > { %v922_v24 = vpop.f32.mrb[22].mxu1  ;;  %v2030_v25 = vpop.f32.mrb[23].mxu0  ;;  %v1271_v21 = vsel %vm1177_vm3, %v1168_v13, 0  ;;  %v1169_v22 = vpack.c.bf16 %v2555_v20, %v2555_v20 }
 0x119   : > { %v2038_v26 = vpop.f32.mrb[23].mxu1 }
 0x11a   : > { %v1317_v25 = vsel %vm1177_vm3, %v1169_v22, 0 }
 0x1db   : > { %v974_v27 = vpop.f32.mrb[24].mxu0  ;;  %v1020_v29 = vpop.f32.mrb[24].mxu1 }
 0x1dc   : > { %v1118_v28 = vmul.f32 0.125, %v974_v27  ;;  %v2043_v30 = vpop.f32.mrb[25].mxu0  ;;  %v2049_v31 = vpop.f32.mrb[25].mxu1  ;;  %v1119_v33 = vmul.f32 0.125, %v1020_v29 }
 0x1dd   : > { %v977_v32 = vpop.f32.mrb[26].mxu0  ;;  %v1023_v34 = vpop.f32.mrb[26].mxu1 }
 0x1de   : > { %v2044_v35 = vpop.f32.mrb[27].mxu0  ;;  %v1122_v36 = vsel %vm933_vm2, %v1118_v28, -inf  ;;  %v2050_v37 = vpop.f32.mrb[27].mxu1  ;;  %v1125_v38 = vsel %vm933_vm2, %v1119_v33, -inf }
 0x1df   : > { %1123 = vmax.xlane.f32.xlu0 %v1122_v36  ;;  %v1539_v37 = vld [vmem:[%s2683_s4] sm:$0xf] }
 0x1e3   : > { %1126 = vmax.xlane.f32.xlu0 %v1125_v38  ;;  %v1066_v39 = vpop.f32.mrb[28].mxu0  ;;  %v1112_v40 = vpop.f32.mrb[28].mxu1 }
 0x1e4   : > { %v1120_v41 = vmul.f32 0.125, %v1066_v39  ;;  %v2055_v42 = vpop.f32.mrb[29].mxu0  ;;  %v2061_v43 = vpop.f32.mrb[29].mxu1  ;;  %v1121_v45 = vmul.f32 0.125, %v1112_v40 }
 0x1e5   : > { %v1069_v44 = vpop.f32.mrb[30].mxu0  ;;  %v1115_v46 = vpop.f32.mrb[30].mxu1  ;;  %v1547_v42 = vsel %vm1177_vm3, %v1539_v37, 0 }
 0x1e6   : > { %v2056_v47 = vpop.f32.mrb[31].mxu0  ;;  %v1128_v48 = vsel %vm933_vm2, %v1120_v41, -inf  ;;  %v2062_v49 = vpop.f32.mrb[31].mxu1  ;;  %v1131_v50 = vsel %vm933_vm2, %v1121_v45, -inf }
 0x1e7   : > { %1129 = vmax.xlane.f32.xlu1 %v1128_v48 }
 0x1eb   : > { %1132 = vmax.xlane.f32.xlu1 %v1131_v50  ;;  %v1540_v50 = vld [vmem:[%s2683_s4 + $0x4] sm:$0xf] }
 0x26c   : > { %v1124_v51 = vpop.xlane.xlu0 %1123 }
 0x26d   : > { %v1134_v52 = vsub.f32 %v1118_v28, %v1124_v51  ;;  %v1593_v51 = vsel %vm1177_vm3, %v1540_v50, 0 }
 0x26f   : > { %v1138_v53 = vmul.f32 1.442695, %v1134_v52  ;;  %v1541_v52 = vld [vmem:[%s2683_s4 + $0x8] sm:$0xf] }
 0x270   : > { %v1127_v54 = vpop.xlane.xlu0 %1126 }
 0x271   : > { %2200 = vpow2.f32 %v1138_v53  ;;  %v1135_v55 = vsub.f32 %v1119_v33, %v1127_v54 }
 0x273   : > { %v1140_v56 = vmul.f32 1.442695, %v1135_v55 }
 0x274   : > { %v1130_v57 = vpop.xlane.xlu1 %1129 }
 0x275   : > { %2202 = vpow2.f32 %v1140_v56  ;;  %v1136_v58 = vsub.f32 %v1120_v41, %v1130_v57  ;;  %v1639_v56 = vsel %vm1177_vm3, %v1541_v52, 0 }
 0x277   : > { %v1142_v59 = vmul.f32 1.442695, %v1136_v58  ;;  %v1542_v58 = vld [vmem:[%s2683_s4 + $0xc] sm:$0xf] }
 0x278   : > { %v1133_v60 = vpop.xlane.xlu1 %1132 }
 0x279   : > { %2204 = vpow2.f32 %v1142_v59  ;;  %v1137_v61 = vsub.f32 %v1121_v45, %v1133_v60 }
 0x27b   : > { %v2201_v62 = vpop.eup %2200  ;;  %v1144_v63 = vmul.f32 1.442695, %v1137_v61 }
 0x27c   : > { %v1146_v0 = vsel %vm933_vm2, %v2201_v62, 0.0 }
 0x27d   : > { %2206 = vpow2.f32 %v1144_v63  ;;  %1147 = vadd.xlane.f32.xlu0 %v1146_v0  ;;  %v1685_v63 = vsel %vm1177_vm3, %v1542_v58, 0 }
 0x27f   : > { %v2203_v2 = vpop.eup %2202 }
 0x280   : > { %v1149_v3 = vsel %vm933_vm2, %v2203_v2, 0.0 }
 0x281   : > { %1150 = vadd.xlane.f32.xlu1 %v1149_v3 }
 0x283   : > { %v2205_v4 = vpop.eup %2204 }
 0x284   : > { %v1152_v5 = vsel %vm933_vm2, %v2205_v4, 0.0 }
 0x285   : > { %1153 = vadd.xlane.f32.xlu0 %v1152_v5 }
 0x287   : > { %v2207_v6 = vpop.eup %2206 }
 0x288   : > { %v1155_v7 = vsel %vm933_vm2, %v2207_v6, 0.0 }
 0x289   : > { %1156 = vadd.xlane.f32.xlu1 %v1155_v7 }
 0x30a   : > { %v1148_v8 = vpop.xlane.xlu0 %1147 }
 0x30b   : > { %2208 = vrcp.f32 %v1148_v8 }
 0x30e   : > { %v1151_v9 = vpop.xlane.xlu1 %1150 }
 0x30f   : > { %2210 = vrcp.f32 %v1151_v9 }
 0x312   : > { %v1154_v10 = vpop.xlane.xlu0 %1153 }
 0x313   : > { %2212 = vrcp.f32 %v1154_v10 }
 0x315   : > { %v2209_v11 = vpop.eup %2208 }
 0x316   : > { %v1162_v14 = vmul.f32 %v2209_v11, %v2201_v62  ;;  %v1157_v15 = vpop.xlane.xlu1 %1156 }
 0x317   : > { %2214 = vrcp.f32 %v1157_v15 }
 0x318   : > { %v1170_v16 = vpack.c.bf16 %v1162_v14, %v1162_v14 }
 0x319   : > { %v2211_v18 = vpop.eup %2210 }
 0x31a   : > { %v1163_v23 = vmul.f32 %v2211_v18, %v2203_v2  ;;  %2066 = vmatmul.mubr.msk.bf16.vlgmr.msra.gmra.mrb[32].mxu0 %vm933_vm2, %v1170_v16 }
 0x31b   : > { %2076 = vmatpush3.bf16.msra.mxu0 %v1271_v21  ;;  %2077 = vmatprep.mubr.msk.bf16.mxu0 %vm2281_vm0, %v2280_v1 }
 0x31c   : > { %v1171_v24 = vpack.c.bf16 %v1163_v23, %v1163_v23  ;;  %2087 = vmatprep.subr.bf16.mxu0 %v2280_v1 }
 0x31d   : > { %v2213_v19 = vpop.eup %2212 }
 0x31e   : > { %v1164_v26 = vmul.f32 %v2213_v19, %v2205_v4  ;;  %2072 = vmatmul.mubr.msk.bf16.vlgmr.msra.gmra.mrb[32].mxu1 %vm933_vm2, %v1171_v24 }
 0x31f   : > { %2082 = vmatpush3.bf16.msra.mxu1 %v1317_v25  ;;  %2083 = vmatprep.mubr.msk.bf16.mxu1 %vm2281_vm0, %v2280_v1 }
 0x320   : > { %v1172_v20 = vpack.c.bf16 %v1164_v26, %v1164_v26  ;;  %2093 = vmatprep.subr.bf16.mxu1 %v2280_v1 }
 0x321   : > { %v2215_v27 = vpop.eup %2214 }
 0x322   : > { %v1165_v28 = vmul.f32 %v2215_v27, %v2207_v6  ;;  %2078 = vmatmul.mubr.msk.bf16.vlgmr.msra.gmra.mrb[36].mxu0 %vm933_vm2, %v1172_v20 }
 0x323   : > { %2088 = vmatpush3.bf16.msra.mxu0 %v2544_v12  ;;  %2089 = vmatprep.mubr.msk.bf16.mxu0 %vm2281_vm0, %v2280_v1 }
 0x324   : > { %v1173_v29 = vpack.c.bf16 %v1165_v28, %v1165_v28  ;;  %2099 = vmatprep.subr.bf16.mxu0 %v2280_v1 }
 0x326   : > { %2084 = vmatmul.mubr.msk.bf16.vlgmr.msra.gmra.mrb[36].mxu1 %vm933_vm2, %v1173_v29  ;;  %v1870_v29 = vld [vmem:[%s2684_s5] ss:$0 sm:$0xff] }
 0x327   : > { %2094 = vmatpush3.bf16.msra.mxu1 %v2548_v17  ;;  %2095 = vmatprep.mubr.msk.bf16.mxu1 %vm2281_vm0, %v2280_v1 }
 0x328   : > { %2105 = vmatprep.subr.bf16.mxu1 %v2280_v1 }
 0x3ed   : > { %v1215_v30 = vpop.f32.mrb[32].mxu0 }
 0x3ee   : > { %v1359_v31 = vpack.c.bf16 %v1215_v30, %v1215_v30  ;;  %v2067_v32 = vpop.f32.mrb[33].mxu0 }
 0x3ef   : > { %v1218_v33 = vpop.f32.mrb[34].mxu0 }
 0x3f0   : > { %v2068_v12 = vpop.f32.mrb[35].mxu0  ;;  %2090 = vmatmul.mubr.msk.bf16.vlgmr.msra.gmra.mrb[40].mxu0 %vm933_vm2, %v1359_v31 }
 0x3f1   : > { %2100 = vmatpush3.bf16.msra.mxu0 %v1271_v21  ;;  %v1261_v34 = vpop.f32.mrb[32].mxu1  ;;  %2101 = vmatprep.mubr.msk.bf16.mxu0 %vm2281_vm0, %v2280_v1 }
 0x3f2   : > { %v1360_v35 = vpack.c.bf16 %v1261_v34, %v1261_v34  ;;  %v2073_v36 = vpop.f32.mrb[33].mxu1  ;;  %2111 = vmatprep.subr.bf16.mxu0 %v2280_v1 }
 0x3f3   : > { %v1264_v17 = vpop.f32.mrb[34].mxu1 }
 0x3f4   : > { %v2074_v38 = vpop.f32.mrb[35].mxu1  ;;  %2096 = vmatmul.mubr.msk.bf16.vlgmr.msra.gmra.mrb[40].mxu1 %vm933_vm2, %v1360_v35 }
 0x3f5   : > { %2106 = vmatpush3.bf16.msra.mxu1 %v1317_v25  ;;  %v1307_v39 = vpop.f32.mrb[36].mxu0  ;;  %2107 = vmatprep.mubr.msk.bf16.mxu1 %vm2281_vm0, %v2280_v1 }
 0x3f6   : > { %v1361_v40 = vpack.c.bf16 %v1307_v39, %v1307_v39  ;;  %v2079_v41 = vpop.f32.mrb[37].mxu0  ;;  %2117 = vmatprep.subr.bf16.mxu1 %v2280_v1 }
 0x3f7   : > { %v1310_v43 = vpop.f32.mrb[38].mxu0 }
 0x3f8   : > { %v2080_v44 = vpop.f32.mrb[39].mxu0  ;;  %2102 = vmatmul.mubr.msk.bf16.vlgmr.msra.gmra.mrb[44].mxu0 %vm933_vm2, %v1361_v40 }
 0x3f9   : > { %v1353_v45 = vpop.f32.mrb[36].mxu1  ;;  %2112 = vmatpush3.bf16.msra.mxu0 %v1547_v42  ;;  %2113 = vmatprep.mubr.msk.bf16.mxu0 %vm2281_vm0, %v2280_v1 }
 0x3fa   : > { %v1362_v46 = vpack.c.bf16 %v1353_v45, %v1353_v45  ;;  %v2085_v47 = vpop.f32.mrb[37].mxu1  ;;  %2123 = vmatprep.subr.bf16.mxu0 %v2280_v1 }
 0x3fb   : > { %v1356_v48 = vpop.f32.mrb[38].mxu1 }
 0x3fc   : > { %v2086_v49 = vpop.f32.mrb[39].mxu1  ;;  %2108 = vmatmul.mubr.msk.bf16.vlgmr.msra.gmra.mrb[44].mxu1 %vm933_vm2, %v1362_v46 }
 0x3fd   : > { %2119 = vmatprep.mubr.msk.bf16.mxu1 %vm2281_vm0, %v2280_v1  ;;  %2118 = vmatpush3.bf16.msra.mxu1 %v1593_v51 }
 0x3fe   : > { %2129 = vmatprep.subr.bf16.mxu1 %v2280_v1 }
 0x4c3   : > { %v1400_v53 = vpop.f32.mrb[40].mxu0 }
 0x4c4   : > { %v1535_v54 = vpack.c.bf16 %v1400_v53, %v1400_v53  ;;  %v2091_v55 = vpop.f32.mrb[41].mxu0 }
 0x4c5   : > { %v1403_v57 = vpop.f32.mrb[42].mxu0 }
 0x4c6   : > { %v2092_v59 = vpop.f32.mrb[43].mxu0  ;;  %2114 = vmatmul.mubr.msk.bf16.vlgmr.msra.gmra.mrb[48].mxu0 %vm933_vm2, %v1535_v54 }
 0x4c7   : > { %v1443_v60 = vpop.f32.mrb[40].mxu1  ;;  %2124 = vmatpush3.bf16.msra.mxu0 %v1639_v56  ;;  %2125 = vmatprep.mubr.msk.bf16.mxu0 %vm2281_vm0, %v2280_v1 }
 0x4c8   : > { %v1536_v61 = vpack.c.bf16 %v1443_v60, %v1443_v60  ;;  %v2097_v62 = vpop.f32.mrb[41].mxu1 }
 0x4c9   : > { %v1446_v0 = vpop.f32.mrb[42].mxu1 }
 0x4ca   : > { %v2098_v2 = vpop.f32.mrb[43].mxu1  ;;  %2120 = vmatmul.mubr.msk.bf16.vlgmr.msra.gmra.mrb[48].mxu1 %vm933_vm2, %v1536_v61 }
 0x4cb   : > { %v1486_v3 = vpop.f32.mrb[44].mxu0  ;;  %2130 = vmatpush3.bf16.msra.mxu1 %v1685_v63  ;;  %2131 = vmatprep.mubr.msk.bf16.mxu1 %vm2281_vm0, %v2280_v1 }
 0x4cc   : > { %v1537_v4 = vpack.c.bf16 %v1486_v3, %v1486_v3  ;;  %v2103_v5 = vpop.f32.mrb[45].mxu0 }
 0x4cd   : > { %v1489_v6 = vpop.f32.mrb[46].mxu0 }
 0x4ce   : > { %v2104_v7 = vpop.f32.mrb[47].mxu0  ;;  %2126 = vmatmul.mubr.msk.bf16.vlgmr.msra.gmra.mrb[52].mxu0 %vm933_vm2, %v1537_v4 }
 0x4cf   : > { %v1529_v8 = vpop.f32.mrb[44].mxu1 }
 0x4d0   : > { %v1538_v9 = vpack.c.bf16 %v1529_v8, %v1529_v8  ;;  %v2109_v10 = vpop.f32.mrb[45].mxu1 }
 0x4d1   : > { %v1532_v11 = vpop.f32.mrb[46].mxu1 }
 0x4d2   : > { %v2110_v13 = vpop.f32.mrb[47].mxu1  ;;  %2132 = vmatmul.mubr.msk.bf16.vlgmr.msra.gmra.mrb[52].mxu1 %vm933_vm2, %v1538_v9 }
 0x599   : > { %v1583_v14 = vpop.f32.mrb[48].mxu0 }
 0x59a   : > { %v2115_v15 = vpop.f32.mrb[49].mxu0 }
 0x59b   : > { %v1586_v16 = vpop.f32.mrb[50].mxu0 }
 0x59c   : > { %v2116_v18 = vpop.f32.mrb[51].mxu0 }
 0x59d   : > { %v1629_v1 = vpop.f32.mrb[48].mxu1 }
 0x59e   : > { %v1727_v21 = vadd.f32 %v1629_v1, %v1583_v14  ;;  %v2121_v22 = vpop.f32.mrb[49].mxu1 }
 0x59f   : > { %v1632_v23 = vpop.f32.mrb[50].mxu1 }
 0x5a0   : > { %v2122_v24 = vpop.f32.mrb[51].mxu1 }
 0x5a1   : > { %v1675_v19 = vpop.f32.mrb[52].mxu0 }
 0x5a2   : > { %v1728_v25 = vadd.f32 %v1727_v21, %v1675_v19  ;;  %v2127_v26 = vpop.f32.mrb[53].mxu0 }
 0x5a3   : > { %v1678_v20 = vpop.f32.mrb[54].mxu0 }
 0x5a4   : > { %v2128_v27 = vpop.f32.mrb[55].mxu0 }
 0x5a5   : > { %v1721_v28 = vpop.f32.mrb[52].mxu1 }
 0x5a6   : > { %v1729_v30 = vadd.f32 %v1728_v25, %v1721_v28  ;;  %v2133_v31 = vpop.f32.mrb[53].mxu1 }
 0x5a7   : > { %v1724_v32 = vpop.f32.mrb[54].mxu1 }
 0x5a8   : > { %v1737_v33 = vadd.f32 %v1870_v29, %v1729_v30  ;;  %v2134_v12 = vpop.f32.mrb[55].mxu1 }
 0x5aa   : > { %1738 = vst [vmem:[%s242_s15] sm:$0xff] %v1737_v33 }
 0x5ab   : > { %2229 = shalt.err (!%p2226_p3)
}
 0x5ac   : > { %s2230_s9 = scalar_lea.hbm %s2637_s19, 128  ;;  %s2234_s12 = scalar_lea.hbm %s2685_s6, 256 }
 0x5ad   : > { %p2231_p4 = scmp.ne.s32.totalorder %s2637_s19, %s2230_s9  ;;  %p2235_p9 = scmp.lt.u32.totalorder %s2637_s19, %s2685_s6 }
 0x5ae   : > { %p2236_p10 = scmp.lt.u32.totalorder %s2234_s12, %s2230_s9  ;;  %p2238_p12 = scmp.lt.u32.totalorder %s2230_s9, %s2637_s19 }
 0x5af   : > { %p2232_p7 = pnand %p2231_p4, %p2356_p5 }
 0x5b0   : > { %p2237_p11 = por %p2236_p10, %p2235_p9 }
 0x5b1   : > { %p2233_p8 = pneg %p2232_p7 }
 0x5b2   : > { %p2239_p13 = por %p2238_p12, %p2237_p11 }
 0x5b4   : > { %p2240_p0 = pnand %p2239_p13, %p2233_p8 }
 0x5b6   : > { %2243 = shalt.err (!%p2240_p0)
}
 0x5b7   : > { %2135 = dma.vmem_to_hbm [thread:$0]  (%p2356_p5), %s2639_s16, 128, %s2637_s19, %s1740_s20  }
 0x5b8 PF: > { %p2141_p1 = scmp.ge.s32.totalorder %s2278_s24, 2  ;;  %s1765_s15 = sand.u32 1, %s2266_s21  }
 0x5b9   : > { %s1766_s17 = scalar_lea.sflag [#allocation3], %s1765_s15 }
 0x5ba   : > { %p2138_p2 = pnand %p2141_p1, %p2360_p6 }
 0x5bc   : > { %2261 = dma.done.wait (!%p2138_p2), %s1766_s17, 128  }
 0x5bd   : > { %2263 = vsyncadd (!%p2138_p2), %s1766_s17, 4294967168  ;;  %p16_p3 = scmp.ge.s32.totalorder %s2343_s27, 4   ;;  %s2688_s21 = smov %s2270_s22 }
 0x5be   : > { %s2689_s22 = smov %s2274_s23  ;;  %s2690_s23 = smov %s2354_s30 }
 0x5bf   : > { %s2691_s24 = smov %s2343_s27  ;;  %18 = sbr.rel (!%p16_p3) target bundleno = 3 (0x3), region = 79 }
 0x5c6   :  { %1771 = vsyncpa [#allocation3], 1 }
 0x5c7   :  { %1773 = vsyncpa [#allocation3 + $0x1], 1 }

</bundles_post_ra>
